<compile_context>
chip_gen: v6e
topology: v6e:2x2x1
jax: 0.10.0
libtpu: 0.0.40
codegen_flags: <defaults>
</compile_context>

<pallas_src>
import functools

import jax
import jax.numpy as jnp
from jax.experimental import pallas as pl
from jax.experimental.pallas import tpu as pltpu


def _argmax_dim1_kernel(x_ref, out_ref, max_sc, idx_sc, *, c_total):
    """Online row-wise argmax over the class axis, one (TB, TC) tile per step.

    Grid = (batch_tiles, class_tiles); the class axis is the reduction axis
    (last, "arbitrary").  Running max / best index live in VMEM scratch; the
    result is stored on the final class step.
    """
    k = pl.program_id(1)

    @pl.when(k == 0)
    def _():
        max_sc[...] = jnp.full_like(max_sc, -jnp.inf)
        idx_sc[...] = jnp.zeros_like(idx_sc)

    x = x_ref[...].astype(jnp.float32)                        # upcast in-register only
    tb, tc = x.shape
    col = jax.lax.broadcasted_iota(jnp.int32, (tb, tc), 1) + k * tc
    valid = col < c_total                                     # mask OOB class padding
    xv = jnp.where(valid, x, -jnp.inf)

    tile_max = jnp.max(xv, axis=1, keepdims=True)             # [TB, 1]
    # First-occurrence index of the tile max.  NaN lanes also count as hits so
    # that rows containing NaN pick the first NaN index (torch.argmax behavior).
    is_hit = ((xv == tile_max) | jnp.isnan(x)) & valid
    tile_idx = jnp.min(jnp.where(is_hit, col, jnp.int32(c_total)),
                       axis=1, keepdims=True)                 # [TB, 1]

    run_max = max_sc[...]
    run_idx = idx_sc[...]
    # Strict ">" keeps the earlier index on ties (first occurrence); NaN beats
    # any finite running max (and once running is NaN it stays, like torch).
    better = (tile_max > run_max) | (jnp.isnan(tile_max) & ~jnp.isnan(run_max))
    max_sc[...] = jnp.where(better, tile_max, run_max)
    idx_sc[...] = jnp.where(better, tile_idx, run_idx)

    @pl.when(k == pl.num_programs(1) - 1)
    def _():
        out_ref[...] = idx_sc[...]


def _pallas_argmax_dim1(logits, *, tb_max=256, tc_max=2048):
    """argmax(logits, axis=1) via a tiled, pipelined Pallas kernel."""
    B, C = logits.shape
    # Batch tile: full B if small (block == full dim satisfies tiling rule),
    # otherwise a multiple of 8 (f32 sublanes).  tb_max=256 keeps 2x-buffered
    # f32 tiles of (256, tc_max=2048) at ~4 MiB -- well inside the scoped VMEM
    # budget on v5e (16 MiB), v6e (32 MiB) and v7x (32 MiB default / 64 MiB phys).
    TB = B if B <= tb_max else tb_max
    # Class tile: full C when small, else a multiple of 128 (lanes); partially
    # out-of-bounds last tile is masked in-kernel via `col < C`.
    TC = C if C <= tc_max else tc_max
    grid = (pl.cdiv(B, TB), pl.cdiv(C, TC))

    kernel = functools.partial(_argmax_dim1_kernel, c_total=C)
    out = pl.pallas_call(
        kernel,
        out_shape=jax.ShapeDtypeStruct((B, 1), jnp.int32),
        grid_spec=pltpu.PrefetchScalarGridSpec(
            num_scalar_prefetch=0,
            grid=grid,
            in_specs=[pl.BlockSpec((TB, TC), lambda i, k: (i, k))],
            out_specs=pl.BlockSpec((TB, 1), lambda i, k: (i, 0)),
            scratch_shapes=[pltpu.VMEM((TB, 1), jnp.float32),
                            pltpu.VMEM((TB, 1), jnp.int32)],
        ),
        compiler_params=pltpu.CompilerParams(
            dimension_semantics=("parallel", "arbitrary")),
    )(logits)
    return out[:, 0]


def predict(logits: jax.Array, *, force_pallas: bool = False,
            tb_max: int = 256, tc_max: int = 2048) -> jax.Array:
    """Pallas equivalent of BaseModel.predict on already-computed logits.

    logits: [B, num_classes] float array (native dtype kept on the wire)
    returns [B] int32 predicted class indices.
    """
    B, C = logits.shape
    # Tiny inputs: the pallas_call launch + per-step overhead dominates; plain
    # XLA argmax is faster.  `force_pallas=True` overrides (used for testing).
    if not force_pallas and B * C < 8 * 128:
        return jnp.argmax(logits, axis=1).astype(jnp.int32)
    return _pallas_argmax_dim1(logits, tb_max=tb_max, tc_max=tc_max)


if __name__ == "__main__":
    key = jax.random.PRNGKey(0)
    k1, k2 = jax.random.split(key)

    # Case 1: module-consistent small shape (MNIST-like head: batch=2, 10 classes).
    B1, C1 = 2, 10
    x1 = jax.random.normal(k1, (B1, C1), dtype=jnp.float32)   # stand-in for forward(x)
    pred1 = jax.block_until_ready(predict(x1, force_pallas=True))
    ref1 = jnp.argmax(x1, axis=1).astype(jnp.int32)
    assert pred1.shape == (B1,)
    assert bool(jnp.all(pred1 == ref1))

    # Case 2: bf16 logits exercising native-dtype load, batch tiling, and the
    # online class-axis reduction (TC forced to 128 so C=1000 spans 8 tiles
    # with a masked, partially out-of-bounds last tile).
    B2, C2 = 64, 1000
    x2 = jax.random.normal(k2, (B2, C2), dtype=jnp.float32).astype(jnp.bfloat16)
    pred2 = jax.block_until_ready(predict(x2, force_pallas=True, tc_max=128))
    ref2 = jnp.argmax(x2, axis=1).astype(jnp.int32)
    assert pred2.shape == (B2,)
    assert bool(jnp.all(pred2 == ref2))

    print("KERNEL_OK")
</pallas_src>

<mosaic_0001>
module attributes {stable_mosaic.version = 11 : i64} {
  func.func @_argmax_dim1_kernel(%arg0: i32, %arg1: i32, %arg2: memref<2x10xf32, #tpu.memory_space<vmem>>, %arg3: memref<2x1xi32, #tpu.memory_space<vmem>>, %arg4: memref<2x1xf32, #tpu.memory_space<vmem>>, %arg5: memref<2x1xi32, #tpu.memory_space<vmem>>) attributes {dimension_semantics = [#tpu.dimension_semantics<parallel>, #tpu.dimension_semantics<arbitrary>], iteration_bounds = array<i64: 1, 1>, scalar_prefetch = 0 : i64, scratch_operands = 2 : i64, tpu.core_type = #tpu.core_type<tc>, window_params = [{transform_indices = @transform_0, window_bounds = array<i64: 2, 10>}, {transform_indices = @transform_1, window_bounds = array<i64: 2, 1>}]} {
    %c0_i32 = arith.constant 0 : i32
    %0 = arith.cmpi eq, %arg1, %c0_i32 : i32
    %1 = arith.extui %0 : i1 to i32
    %c0_i32_0 = arith.constant 0 : i32
    %2 = arith.cmpi ne, %1, %c0_i32_0 : i32
    scf.if %2 {
      %cst_17 = arith.constant 0xFF800000 : f32
      %38 = vector.broadcast %cst_17 : f32 to vector<2x1xf32>
      %c0_18 = arith.constant 0 : index
      %c0_19 = arith.constant 0 : index
      %39 = vector.load %arg4[%c0_18, %c0_19] : memref<2x1xf32, #tpu.memory_space<vmem>>, vector<2x1xf32>
      tpu.vector_store %arg4[%c0_18, %c0_19], %38 {strides = array<i32>} : memref<2x1xf32, #tpu.memory_space<vmem>>, vector<2x1xf32>,
      %c0_i32_20 = arith.constant 0 : i32
      %40 = vector.broadcast %c0_i32_20 : i32 to vector<2x1xi32>
      %c0_21 = arith.constant 0 : index
      %c0_22 = arith.constant 0 : index
      %41 = vector.load %arg5[%c0_21, %c0_22] : memref<2x1xi32, #tpu.memory_space<vmem>>, vector<2x1xi32>
      tpu.vector_store %arg5[%c0_21, %c0_22], %40 {strides = array<i32>} : memref<2x1xi32, #tpu.memory_space<vmem>>, vector<2x1xi32>,
    } else {
    }
    %c0 = arith.constant 0 : index
    %c0_1 = arith.constant 0 : index
    %3 = vector.load %arg2[%c0, %c0_1] : memref<2x10xf32, #tpu.memory_space<vmem>>, vector<2x10xf32>
    %4 = tpu.iota {dimensions = array<i32: 1>} : vector<2x10xi32>
    %c10_i32 = arith.constant 10 : i32
    %5 = arith.muli %arg1, %c10_i32 : i32
    %6 = vector.broadcast %5 : i32 to vector<2x10xi32>
    %7 = arith.addi %4, %6 : vector<2x10xi32>
    %c10_i32_2 = arith.constant 10 : i32
    %8 = vector.broadcast %c10_i32_2 : i32 to vector<2x10xi32>
    %9 = arith.cmpi slt, %7, %8 : vector<2x10xi32>
    %cst = arith.constant 0xFF800000 : f32
    %10 = vector.broadcast %cst : f32 to vector<2x10xf32>
    %11 = arith.select %9, %3, %10 : vector<2x10xi1>, vector<2x10xf32>
    %cst_3 = arith.constant dense<0xFF800000> : vector<2xf32>
    %12 = vector.multi_reduction <maximumf>, %11, %cst_3 [1] : vector<2x10xf32> to vector<2xf32>
    %13 = vector.shape_cast %12 : vector<2xf32> to vector<2x1xf32>
    %14 = vector.broadcast %13 : vector<2x1xf32> to vector<2x10xf32>
    %15 = arith.cmpf oeq, %11, %14 : vector<2x10xf32>
    %16 = arith.cmpf one, %3, %3 : vector<2x10xf32>
    %17 = arith.ori %15, %16 : vector<2x10xi1>
    %18 = arith.andi %17, %9 : vector<2x10xi1>
    %c10_i32_4 = arith.constant 10 : i32
    %19 = vector.broadcast %c10_i32_4 : i32 to vector<2x10xi32>
    %20 = arith.select %18, %7, %19 : vector<2x10xi1>, vector<2x10xi32>
    %cst_5 = arith.constant dense<2147483647> : vector<2xi32>
    %21 = vector.multi_reduction <minsi>, %20, %cst_5 [1] : vector<2x10xi32> to vector<2xi32>
    %22 = vector.shape_cast %21 : vector<2xi32> to vector<2x1xi32>
    %c0_6 = arith.constant 0 : index
    %c0_7 = arith.constant 0 : index
    %23 = vector.load %arg4[%c0_6, %c0_7] : memref<2x1xf32, #tpu.memory_space<vmem>>, vector<2x1xf32>
    %c0_8 = arith.constant 0 : index
    %c0_9 = arith.constant 0 : index
    %24 = vector.load %arg5[%c0_8, %c0_9] : memref<2x1xi32, #tpu.memory_space<vmem>>, vector<2x1xi32>
    %25 = arith.cmpf ogt, %13, %23 : vector<2x1xf32>
    %26 = arith.cmpf one, %13, %13 : vector<2x1xf32>
    %27 = arith.cmpf one, %23, %23 : vector<2x1xf32>
    %cst_10 = arith.constant dense<true> : vector<2x1xi1>
    %28 = arith.xori %27, %cst_10 : vector<2x1xi1>
    %29 = arith.andi %26, %28 : vector<2x1xi1>
    %30 = arith.ori %25, %29 : vector<2x1xi1>
    %31 = arith.select %30, %13, %23 : vector<2x1xi1>, vector<2x1xf32>
    %c0_11 = arith.constant 0 : index
    %c0_12 = arith.constant 0 : index
    %32 = vector.load %arg4[%c0_11, %c0_12] : memref<2x1xf32, #tpu.memory_space<vmem>>, vector<2x1xf32>
    tpu.vector_store %arg4[%c0_11, %c0_12], %31 {strides = array<i32>} : memref<2x1xf32, #tpu.memory_space<vmem>>, vector<2x1xf32>,
    %33 = arith.select %30, %22, %24 : vector<2x1xi1>, vector<2x1xi32>
    %c0_13 = arith.constant 0 : index
    %c0_14 = arith.constant 0 : index
    %34 = vector.load %arg5[%c0_13, %c0_14] : memref<2x1xi32, #tpu.memory_space<vmem>>, vector<2x1xi32>
    tpu.vector_store %arg5[%c0_13, %c0_14], %33 {strides = array<i32>} : memref<2x1xi32, #tpu.memory_space<vmem>>, vector<2x1xi32>,
    %c0_i32_15 = arith.constant 0 : i32
    %35 = arith.cmpi eq, %arg1, %c0_i32_15 : i32
    %36 = arith.extui %35 : i1 to i32
    %c0_i32_16 = arith.constant 0 : i32
    %37 = arith.cmpi ne, %36, %c0_i32_16 : i32
    scf.if %37 {
      %c0_17 = arith.constant 0 : index
      %c0_18 = arith.constant 0 : index
      %38 = vector.load %arg5[%c0_17, %c0_18] : memref<2x1xi32, #tpu.memory_space<vmem>>, vector<2x1xi32>
      %c0_19 = arith.constant 0 : index
      %c0_20 = arith.constant 0 : index
      %39 = vector.load %arg3[%c0_19, %c0_20] : memref<2x1xi32, #tpu.memory_space<vmem>>, vector<2x1xi32>
      tpu.vector_store %arg3[%c0_19, %c0_20], %38 {strides = array<i32>} : memref<2x1xi32, #tpu.memory_space<vmem>>, vector<2x1xi32>,
    } else {
    }
    return
  }
  func.func @transform_0(%arg0: i32, %arg1: i32) -> (i32, i32) {
    %c0_i32 = arith.constant 0 : i32
    return %arg0, %arg1 : i32, i32
  }
  func.func @transform_1(%arg0: i32, %arg1: i32) -> (i32, i32) {
    %c0_i32 = arith.constant 0 : i32
    %c0_i32_0 = arith.constant 0 : i32
    return %arg0, %c0_i32 : i32, i32
  }
}

</mosaic_0001>

<bundles_post_ra>
// kernel: tpu_custom_call.1
= control target key start
LH: loop header
LB: loop body
LE: loop exit
PB: predicated region body
PF: predicated region fallthrough
CT: control target
= control target key end

     0   :  { %6 = vsyncpa [#allocation5], 0  ;;  %s108_s6 = smov [#allocation4]   ;;  %s145_s0 = inlined_call_operand.hbm [shape: f32[2,10], index: 0, kind: input, shape index: {}]   ;;  %s146_s1 = inlined_call_operand.vmem [shape: s32[2,1], index: 1, kind: output, shape index: {}]  }
   0x1   :  { %s13_s7 = sshll.u32 %s108_s6, 4  ;;  %s14_s7 = int_to_ptr.vmem [resolvable:$true] %s13_s7 }
   0x2   :  { %s94_s8 = scalar_lea.vmem %s14_s7, 32  ;;  %p99_p1 = scmp.lt.s32.totalorder %s14_s7, %s14_s7 }
   0x3   :  { %p95_p0 = scmp.ne.s32.totalorder %s14_s7, %s94_s8  ;;  %p100_p2 = scmp.lt.s32.totalorder %s94_s8, %s94_s8 }
   0x5   :  { %p101_p3 = por %p100_p2, %p99_p1 }
   0x7   :  { %p102_p4 = pnand %p101_p3, %p95_p0 }
   0x9   :  { %105 = shalt.err (!%p102_p4)
}
   0xa   :  { %16 = dma.hbm_to_vmem [thread:$0]  %s145_s0, 32, %s14_s7, [#allocation5]  }
   0xb   :  { %106 = dma.done.wait [#allocation5], 32  }
   0xc   :  { %107 = vsyncadd [#allocation5], 4294967264  ;;  %v28_v0 = vlaneseq  ;;  %vm24_vm0 = vcmask 1024   ;;  %v109_v1 = vmov -inf   ;;  %vm35_vm2 = vcmask 74752  }
   0xd   :  { %25 = vst.msk [vmem:[#allocation2] sm:$0x3] %vm24_vm0, %v109_v1  ;;  %v27_v3 = vld [vmem:[#allocation4] sm:$0x3]  ;;  %vm110_vm4 = vmmov 1   ;;  %v111_v14 = vmov 0  }
   0xe   :  { %v29_v2 = vand.u32 127, %v28_v0  ;;  %vm40_vm6 = vcmp.ne.f32.partialorder %v27_v3, %v27_v3  ;;  %26 = vst.msk [vmem:[#allocation3] sm:$0x3] %vm24_vm0, %v111_v14 }
  0x10   :  { %vm33_vm1 = vcmp.lt.s32.totalorder %v29_v2, 10 }
  0x11   :  { %v34_v4 = vsel %vm33_vm1, %v27_v3, -inf }
  0x12   :  { %v36_v5 = vsel %vm35_vm2, %v34_v4, -inf }
  0x13   :  { %37 = vmax.xlane.f32.xlu0 %v36_v5 }
  0x14   :  { %v59_v6 = vld [vmem:[#allocation2] sm:$0x3] }
  0x15   :  { %vm63_vm3 = vcmp.ne.f32.partialorder %v59_v6, %v59_v6  ;;  %v60_v23 = vld [vmem:[#allocation3] sm:$0x3] }
  0x16   :  { %vm64_vm5 = vmxor %vm63_vm3, %vm110_vm4 }
  0x9c   :  { %v38_v7 = vpop.xlane.xlu0 %37 }
  0x9d   :  { %vm39_vm7 = vcmp.eq.f32.partialorder %v34_v4, %v38_v7  ;;  %vm61_vm8 = vcmp.gt.f32.partialorder %v38_v7, %v59_v6  ;;  %vm62_vm9 = vcmp.ne.f32.partialorder %v38_v7, %v38_v7 }
  0x9e   :  { %vm65_vm10 = vmand %vm62_vm9, %vm64_vm5 }
  0x9f   :  { %vm128_vm11 = vmor %vm61_vm8, %vm65_vm10 }
  0xa0   :  { %v67_v9 = vsel %vm128_vm11, %v38_v7, %v59_v6  ;;  %vm41_vm12 = vmor %vm39_vm7, %vm40_vm6 }
  0xa1   :  { %69 = vst.msk [vmem:[#allocation2] sm:$0x3] %vm24_vm0, %v67_v9  ;;  %vm42_vm13 = vmand %vm41_vm12, %vm33_vm1 }
  0xa2   :  { %v43_v10 = vsel %vm42_vm13, %v29_v2, 10 }
  0xa3   :  { %v44_v11 = vsel %vm35_vm2, %v43_v10, 2147483647 }
  0xa4   :  { %v46_v12 = vshra.s32 %v44_v11, 16  ;;  %v45_v15 = vand.u32 65535, %v44_v11 }
  0xa6   :  { %v48_v13 = vcvt.s32.f32 %v46_v12  ;;  %v47_v17 = vcvt.s32.f32 %v45_v15 }
  0xa8   :  { %49 = vmin.xlane.f32.xlu0 %v48_v13 }
 0x131   :  { %v50_v16 = vpop.xlane.xlu0 %49 }
 0x132   :  { %vm51_vm14 = vcmp.eq.f32.partialorder %v48_v13, %v50_v16  ;;  %v56_v19 = vcvt.f32.s32 %v50_v16 }
 0x133   :  { %v52_v18 = vsel %vm51_vm14, %v47_v17, inf }
 0x134   :  { %53 = vmin.xlane.f32.xlu1 %v52_v18  ;;  %v57_v21 = vshll.u32 %v56_v19, 16 }
 0x1bd   :  { %v54_v20 = vpop.xlane.xlu1 %53 }
 0x1be   :  { %v55_v22 = vcvt.f32.s32 %v54_v20 }
 0x1c0   :  { %v58_v24 = vadd.s32 %v57_v21, %v55_v22 }
 0x1c2   :  { %v70_v25 = vsel %vm128_vm11, %v58_v24, %v60_v23 }
 0x1c3   :  { %71 = vst.msk [vmem:[#allocation3] sm:$0x3] %vm24_vm0, %v70_v25 }
 0x1ca   :  { %v75_v26 = vld [vmem:[#allocation3] sm:$0x3] }
 0x1cb   :  { %76 = vst.msk [vmem:[%s146_s1] sm:$0x3] %vm24_vm0, %v75_v26 }
 0x1cc   :  { %81 = vsyncpa [#allocation5], 1 }

</bundles_post_ra>
